<compile_context>
chip_gen: v7x
topology: tpu7x:2x2x1
jax: 0.10.0
libtpu: 0.0.40
codegen_flags: <defaults>
</compile_context>

<pallas_src>
import functools
import math

import jax
import jax.numpy as jnp
from jax.experimental import pallas as pl
from jax.experimental.pallas import tpu as pltpu

_LANE = 128


def _round_up(v, m):
    return ((v + m - 1) // m) * m


def _sublane_pack(dtype):
    # Sublane packing: 8 for 4-byte, 16 for 2-byte, 32 for 1-byte dtypes.
    return max(8, 32 // max(jnp.dtype(dtype).itemsize, 1))


def _tpu_vmem_capacity_bytes():
    try:
        info = pltpu.get_tpu_info()
        cap = getattr(info, "vmem_capacity_bytes", None)
        if cap:
            return int(cap)
    except Exception:
        pass
    return 64 * 1024 * 1024  # conservative default (v7x per-TensorCore)


_VMEM_CAP = _tpu_vmem_capacity_bytes()
# <= 64 MiB per core strongly suggests v7x (2 TensorCores/chip): force >= 2
# grid steps per core so neither core idles and the DMA pipeline overlaps.
_MULTI_CORE = _VMEM_CAP <= 64 * 1024 * 1024
_MIN_GRID_STEPS = 4 if _MULTI_CORE else 1
_VMEM_LIMIT = max(32 * 1024 * 1024,
                  min(_VMEM_CAP - 8 * 1024 * 1024, 100 * 1024 * 1024))
_BLOCK_BUDGET = int(_VMEM_LIMIT) * 3 // 4  # headroom for Mosaic internal scratch


def _padded_tile_bytes(block_shape, dtype):
    """VMEM bytes of one tile after (sublane, lane) layout padding."""
    dims = list(block_shape)
    if len(dims) >= 1:
        dims[-1] = _round_up(dims[-1], _LANE)
    if len(dims) >= 2:
        dims[-2] = _round_up(dims[-2], _sublane_pack(dtype))
    return math.prod(dims) * jnp.dtype(dtype).itemsize


def _block_footprint_bytes(block_shape, dtype):
    """Real footprint: 2x in + 2x out double buffers + f32 working copies."""
    io = _padded_tile_bytes(block_shape, dtype)
    work = 2 * _padded_tile_bytes(block_shape, jnp.float32)
    return 4 * io + work


def _log_softmax_kernel(x_ref, o_ref, *, red_axis):
    # Numerically stable log-softmax; f32 accumulation over red_axis.
    x = x_ref[...].astype(jnp.float32)
    m = jnp.max(x, axis=red_axis, keepdims=True)
    lse = jnp.log(jnp.sum(jnp.exp(x - m), axis=red_axis, keepdims=True))
    # Single broadcast subtract: add the two reduced-shape terms first.
    o_ref[...] = (x - (m + lse)).astype(o_ref.dtype)


def _cost(x):
    size = x.size
    itemsize = jnp.dtype(x.dtype).itemsize
    return pl.CostEstimate(flops=6 * size, transcendentals=size,
                           bytes_accessed=2 * size * itemsize)


# ------------------------- tile pickers (padding-aware) ----------------------

def _pick_rows_last(p, n, dtype):
    """Row block for the 2D [P, N] (reduce-over-lanes) path, or None."""
    sub = _sublane_pack(dtype)
    if _block_footprint_bytes((min(p, sub), n), dtype) > _BLOCK_BUDGET:
        return None  # even the minimum legal block blows VMEM (huge N)
    per_row = _block_footprint_bytes((sub, n), dtype) / sub
    rows = max(1, min(p, int(_BLOCK_BUDGET // per_row)))
    if rows >= p:
        rows = p
        if _MIN_GRID_STEPS > 1 and p > sub:
            # v7x: split so both cores get >= 2 pipelined steps.
            rows = min(p, _round_up(pl.cdiv(p, _MIN_GRID_STEPS), sub))
        return rows
    rows = max(sub, (rows // sub) * sub)  # keep sublane-dim divisible by 8/pack
    if _MIN_GRID_STEPS > 1:
        rows = min(rows, max(sub, _round_up(pl.cdiv(p, _MIN_GRID_STEPS), sub)))
    return rows


def _pick_blocks_mid(p, n, q, dtype):
    """(bp, bq) blocks for the 3D [P, N, Q] (reduce-over-middle) path, or None.

    Requires q >= 128 (smaller q is routed to the lane-dense transpose path).
    """
    def fits(bp, bq):
        return _block_footprint_bytes((bp, n, bq), dtype) <= _BLOCK_BUDGET

    # Lane-axis block: prefer full q (fully contiguous DMA per p-row); else a
    # multiple of 128 kept >= 512 so each DMA'd row segment stays >= 2 KiB.
    if fits(1, q):
        bq = q
    else:
        bq = (q // _LANE) * _LANE
        while bq > 512 and not fits(1, bq):
            bq = max(512, ((bq // 2) // _LANE) * _LANE)
        while bq > _LANE and not fits(1, bq):
            bq = max(_LANE, ((bq // 2) // _LANE) * _LANE)
        if not fits(1, bq):
            return None  # huge-N: caller falls back to XLA log_softmax

    per_p = _block_footprint_bytes((1, n, bq), dtype)
    bp = max(1, min(p, int(_BLOCK_BUDGET // per_p)))

    if _MIN_GRID_STEPS > 1:
        # Ensure enough grid steps to feed both v7x cores with >= 2 steps each.
        while pl.cdiv(p, bp) * pl.cdiv(q, bq) < _MIN_GRID_STEPS:
            if bp > 1:
                bp = pl.cdiv(bp, 2)
            elif bq > _LANE:
                bq = max(_LANE, ((bq // 2) // _LANE) * _LANE)
            else:
                break
    return bp, bq


# ------------------------------ pallas_call wrappers -------------------------

def _log_softmax_last(x2d, cost):
    p, n = x2d.shape
    rows = _pick_rows_last(p, n, x2d.dtype)
    if rows is None:
        # TODO(synk): online-LSE two-pass kernel for rows too big for VMEM.
        return jax.nn.log_softmax(x2d, axis=1)
    kernel = functools.partial(_log_softmax_kernel, red_axis=1)
    return pl.pallas_call(
        kernel,
        out_shape=jax.ShapeDtypeStruct((p, n), x2d.dtype),
        grid_spec=pltpu.PrefetchScalarGridSpec(
            num_scalar_prefetch=0,
            grid=(pl.cdiv(p, rows),),
            in_specs=[pl.BlockSpec((rows, n), lambda i: (i, 0))],
            out_specs=pl.BlockSpec((rows, n), lambda i: (i, 0)),
        ),
        compiler_params=pltpu.CompilerParams(
            dimension_semantics=("parallel",),
            vmem_limit_bytes=_VMEM_LIMIT,
        ),
        cost_estimate=cost,
    )(x2d)


def _log_softmax_mid(x3d, cost):
    p, n, q = x3d.shape
    blocks = _pick_blocks_mid(p, n, q, x3d.dtype)
    if blocks is None:
        # TODO(synk): online-LSE two-pass kernel for rows too big for VMEM.
        return jax.nn.log_softmax(x3d, axis=1)
    bp, bq = blocks
    kernel = functools.partial(_log_softmax_kernel, red_axis=1)
    return pl.pallas_call(
        kernel,
        out_shape=jax.ShapeDtypeStruct((p, n, q), x3d.dtype),
        grid_spec=pltpu.PrefetchScalarGridSpec(
            num_scalar_prefetch=0,
            grid=(pl.cdiv(p, bp), pl.cdiv(q, bq)),
            in_specs=[pl.BlockSpec((bp, n, bq), lambda i, j: (i, 0, j))],
            out_specs=pl.BlockSpec((bp, n, bq), lambda i, j: (i, 0, j)),
        ),
        compiler_params=pltpu.CompilerParams(
            dimension_semantics=("parallel", "parallel"),
            vmem_limit_bytes=_VMEM_LIMIT,
        ),
        cost_estimate=cost,
    )(x3d)


def log_softmax(x, axis):
    """Pallas-backed equivalent of torch.log_softmax(x, axis)."""
    axis = axis % x.ndim
    shape = x.shape
    n = shape[axis]
    p = math.prod(shape[:axis]) if axis > 0 else 1
    q = math.prod(shape[axis + 1:]) if axis < x.ndim - 1 else 1
    cost = _cost(x)

    if q == 1:
        # Softmax over the innermost dim: contiguous 2D view [rows, N].
        out = _log_softmax_last(x.reshape(p, n), cost)
        return out.reshape(shape)

    if q < _LANE:
        # Small trailing block: a (.., N, q<128) block would store at q/128
        # lane occupancy (masked vst, ~8x effective-bandwidth hit for q=16).
        # One XLA transpose to make the softmax axis innermost + lane-dense
        # 2D kernel is faster on every generation for this HBM-bound op.
        xt = jnp.moveaxis(x, axis, -1)
        t_shape = xt.shape
        out = _log_softmax_last(xt.reshape(p * q, n), cost)
        return jnp.moveaxis(out.reshape(t_shape), -1, axis)

    # Softmax over a non-innermost dim with a lane-dense trailing block:
    # pure reshape (no transpose), reduce over the middle (sublane) axis.
    out = _log_softmax_mid(x.reshape(p, n, q), cost)
    return out.reshape(shape)


if __name__ == "__main__":
    key = jax.random.PRNGKey(0)

    # Shape implied by the module/test: NCHW-ish tensor, various softmax axes.
    x = jax.random.normal(key, (2, 4, 16, 16), dtype=jnp.float32)
    cases = [(x, 1), (x, -1), (x, 0), (x, 2)]

    # Awkward (non-8/128-divisible) shapes: cdiv grids + partial lane blocks.
    k1, k2 = jax.random.split(key)
    cases.append((jax.random.normal(k1, (5, 100), dtype=jnp.float32), -1))
    cases.append((jax.random.normal(k2, (3, 7, 130), dtype=jnp.float32), 1))

    for xi, axis in cases:
        out = log_softmax(xi, axis)
        jax.block_until_ready(out)
        ref = jax.nn.log_softmax(xi, axis=axis)
        assert out.shape == xi.shape and out.dtype == xi.dtype
        assert jnp.allclose(out, ref, atol=1e-5, rtol=1e-5), (xi.shape, axis)

    print("KERNEL_OK")
</pallas_src>

<mosaic_0001>
module attributes {stable_mosaic.version = 11 : i64} {
  func.func @_log_softmax_kernel(%arg0: i32, %arg1: i32, %arg2: memref<1x4x128xf32, #tpu.memory_space<vmem>>, %arg3: memref<1x4x128xf32, #tpu.memory_space<vmem>>) attributes {dimension_semantics = [#tpu.dimension_semantics<parallel>, #tpu.dimension_semantics<parallel>], iteration_bounds = array<i64: 2, 2>, scalar_prefetch = 0 : i64, scratch_operands = 0 : i64, tpu.core_type = #tpu.core_type<tc>, window_params = [{transform_indices = @transform_0, window_bounds = array<i64: 1, 4, 128>}, {transform_indices = @transform_1, window_bounds = array<i64: 1, 4, 128>}]} {
    %c0 = arith.constant 0 : index
    %c0_0 = arith.constant 0 : index
    %c0_1 = arith.constant 0 : index
    %0 = vector.load %arg2[%c0, %c0_0, %c0_1] : memref<1x4x128xf32, #tpu.memory_space<vmem>>, vector<1x4x128xf32>
    %cst = arith.constant dense<0xFF800000> : vector<1x128xf32>
    %1 = vector.multi_reduction <maximumf>, %0, %cst [1] : vector<1x4x128xf32> to vector<1x128xf32>
    %2 = vector.shape_cast %1 : vector<1x128xf32> to vector<1x1x128xf32>
    %3 = vector.broadcast %2 : vector<1x1x128xf32> to vector<1x4x128xf32>
    %4 = arith.subf %0, %3 : vector<1x4x128xf32>
    %5 = math.exp %4 : vector<1x4x128xf32>
    %cst_2 = arith.constant dense<0.000000e+00> : vector<1x128xf32>
    %6 = vector.multi_reduction <add>, %5, %cst_2 [1] : vector<1x4x128xf32> to vector<1x128xf32>
    %7 = vector.shape_cast %6 : vector<1x128xf32> to vector<1x1x128xf32>
    %8 = math.log %7 : vector<1x1x128xf32>
    %9 = arith.addf %2, %8 : vector<1x1x128xf32>
    %10 = vector.broadcast %9 : vector<1x1x128xf32> to vector<1x4x128xf32>
    %11 = arith.subf %0, %10 : vector<1x4x128xf32>
    %c0_3 = arith.constant 0 : index
    %c0_4 = arith.constant 0 : index
    %c0_5 = arith.constant 0 : index
    %12 = vector.load %arg3[%c0_3, %c0_4, %c0_5] : memref<1x4x128xf32, #tpu.memory_space<vmem>>, vector<1x4x128xf32>
    tpu.vector_store %arg3[%c0_3, %c0_4, %c0_5], %11 {strides = array<i32>} : memref<1x4x128xf32, #tpu.memory_space<vmem>>, vector<1x4x128xf32>,
    return
  }
  func.func @transform_0(%arg0: i32, %arg1: i32) -> (i32, i32, i32) {
    %c0_i32 = arith.constant 0 : i32
    %c0_i32_0 = arith.constant 0 : i32
    return %arg0, %c0_i32, %arg1 : i32, i32, i32
  }
  func.func @transform_1(%arg0: i32, %arg1: i32) -> (i32, i32, i32) {
    %c0_i32 = arith.constant 0 : i32
    %c0_i32_0 = arith.constant 0 : i32
    return %arg0, %c0_i32, %arg1 : i32, i32, i32
  }
}

</mosaic_0001>

<bundles_post_ra>
// kernel: tpu_custom_call.1
= control target key start
LH: loop header
LB: loop body
LE: loop exit
PB: predicated region body
PF: predicated region fallthrough
CT: control target
= control target key end

     0   :  { %6 = vsyncpa [#allocation3], 0  ;;  %s708_s0 = inlined_call_operand.hbm [shape: f32[2,4,256], index: 0, kind: input, shape index: {}]   ;;  %s709_s1 = inlined_call_operand.hbm [shape: f32[2,4,256], index: 1, kind: output, shape index: {}]  }
   0x1   :  { %8 = vsyncpa [#allocation3 + $0x1], 0 }
   0x2   :  { %9 = vsyncpa [#allocation4], 0 }
   0x3   :  { %11 = vsyncpa [#allocation4 + $0x1], 0  ;;  %s514_s6 = smov 0   ;;  %s516_s7 = smov 0  }
   0x4   :  { %s518_s8 = smov 0   ;;  %s520_s9 = smov 0  }
   0x5   :  { %s522_s10 = smov 0   ;;  %s524_s11 = smov 0  }
   0x6   :  { %s526_s12 = smov 0   ;;  %s528_s13 = smov 0  }
   0x7 LB: > { %s275_s14 = sadd.s32 4294967295, %s500_s13   ;;  %s276_s15 = sadd.s32 4294967294, %s500_s13   ;;  %s500_s13 = sphi %s528_s13, %s17_s13   ;;  %s496_s12 = sphi %s526_s12, %s726_s12   ;;  %s492_s11 = sphi %s524_s11, %s725_s11   ;;  %s488_s10 = sphi %s522_s10, %s724_s10   ;;  %s484_s9 = sphi %s520_s9, %s723_s9   ;;  %s480_s8 = sphi %s518_s8, %s722_s8   ;;  %s476_s7 = sphi %s516_s7, %s721_s7   ;;  %s472_s6 = sphi %s514_s6, %s720_s6  }
   0x8   : > { %s26_s16 = sadd.s32 1, %s492_s11  ;;  %s29_s17 = sadd.s32 1, %s496_s12 }
   0x9   : > { %p27_p0 = scmp.ge.s32.totalorder %s26_s16, 2  ;;  %s38_s18 = sadd.s32 1, %s480_s8 }
   0xa   : > { %p45_p1 = scmp.ne.s32.totalorder %s480_s8, %s476_s7  ;;  %p46_p2 = scmp.eq.s32.totalorder %s500_s13, 0 }
   0xb   : > { %s728_s16 = smov (%p27_p0, %s26_s16), 0  ;;  %s730_s17 = smov (!%p27_p0, %s29_s17), %s496_s12 }
   0xc   : > { %s34_s19 = ssub.s32 %s492_s11, %s728_s16  ;;  %p567_p3 = por %p46_p2, %p45_p1 }
   0xd   : > { %p31_p4 = scmp.ge.s32.totalorder %s730_s17, 2  ;;  %p51_p5 = scmp.ne.s32.totalorder %s476_s7, %s472_s6 }
   0xe   : > { %p52_p6 = scmp.eq.s32.totalorder %s275_s14, 0  ;;  %p77_p7 = scmp.eq.s32.totalorder %s275_s14, 3 }
   0xf   : > { %s732_s17 = smov (%p31_p4, %s730_s17), 0  ;;  %p83_p10 = scmp.eq.s32.totalorder %s276_s15, 3 }
  0x10   : > { %p575_p8 = por %p52_p6, %p51_p5  ;;  %p579_p9 = por %p77_p7, %p45_p1 }
  0x11   : > { %s33_s23 = ssub.s32 %s496_s12, %s732_s17  ;;  %p585_p12 = por %p83_p10, %p51_p5 }
  0x12   : > { %s713_s22 = scalar_select %p579_p9, 1, 0 }
  0x13   : > { %s35_s24 = sor.u32 %s34_s19, %s33_s23  ;;  %p302_p13 = scmp.lt.s32.totalorder %s500_s13, 4 }
  0x14   : > { %p36_p11 = scmp.eq.s32.totalorder %s35_s24, 0  ;;  %s103_s26 = sand.u32 1, %s480_s8  }
  0x15   : > { %s714_s25 = scalar_select %p585_p12, 1, 0 }
  0x16   : > { %s592_s27 = scalar_select %p36_p11, %s480_s8, %s38_s18  }
  0x17   : > { %s279_s28 = sshll.u32 %s103_s26, 2  ;;  %s280_s29 = sshll.u32 %s496_s12, 1 }
  0x18   : > { %s112_s30 = sadd.s32 %s492_s11, %s280_s29  ;;  %s107_s2 = scalar_lea.vmem [#allocation2], %s279_s28 }
  0x19   : > { %s116_s3 = sshll.u32 %s107_s2, 4  ;;  %s281_s4 = sshll.u32 %s112_s30, 6  ;;  %s596_s3 = int_to_ptr.vmem [resolvable:$true] %s116_s3 }
  0x1a   : > { %s601_s15 = scalar_lea.hbm %s708_s0, %s281_s4  ;;  %p605_p0 = pnand %p302_p13, %p567_p3 }
  0x1b   : > { %s104_s19 = scalar_lea.sflag [#allocation3], %s103_s26  ;;  %s372_s23 = scalar_lea.hbm %s601_s15, 64 }
  0x1c   : > { %p373_p4 = scmp.ne.s32.totalorder %s601_s15, %s372_s23  ;;  %p374_p5 = pneg %p605_p0 }
  0x1d   : > { %s377_s28 = scalar_lea.hbm %s708_s0, 256  ;;  %p378_p3 = scmp.lt.u32.totalorder %s601_s15, %s708_s0 }
  0x1e   : > { %p375_p6 = pnand %p374_p5, %p373_p4  ;;  %p379_p10 = scmp.lt.u32.totalorder %s377_s28, %s372_s23 }
  0x1f   : > { %p381_p13 = scmp.lt.u32.totalorder %s372_s23, %s601_s15 }
  0x20   : > { %p376_p7 = pneg %p375_p6  ;;  %p380_p11 = por %p379_p10, %p378_p3 }
  0x22   : > { %p382_p1 = por %p381_p13, %p380_p11 }
  0x24   : > { %p383_p2 = pnand %p382_p1, %p376_p7 }
  0x26   : > { %386 = shalt.err (!%p383_p2)
}
  0x27   : > { %s387_s26 = scalar_lea.vmem %s596_s3, 64  ;;  %s502_s2 = smov [#allocation2]  }
  0x28   : > { %p388_p4 = scmp.ne.s32.totalorder %s596_s3, %s387_s26  ;;  %s392_s4 = sshll.u32 %s502_s2, 4  ;;  %s393_s4 = int_to_ptr.vmem [resolvable:$false] %s392_s4 }
  0x29   : > { %s394_s5 = scalar_lea.vmem %s393_s4, 128  ;;  %p395_p9 = scmp.lt.s32.totalorder %s596_s3, %s393_s4 }
  0x2a   : > { %p390_p6 = pnand %p388_p4, %p374_p5  ;;  %p396_p3 = scmp.lt.s32.totalorder %s394_s5, %s387_s26 }
  0x2c   : > { %p391_p12 = pneg %p390_p6  ;;  %p397_p10 = por %p396_p3, %p395_p9 }
  0x2e   : > { %p398_p11 = pnand %p397_p10, %p391_p12 }
  0x30   : > { %401 = shalt.err (!%p398_p11)
}
  0x31   : > { %297 = dma.hbm_to_vmem [thread:$0]  (!%p605_p0), %s601_s15, 64, %s596_s3, %s104_s19  }
  0x32   : > { %p716_p1 = scmp.lt.s32.totalorder %s500_s13, 5  ;;  %p717_p2 = scmp.ge.s32.totalorder %s500_s13, 1 }
  0x34   : > { %p122_p5 = pnand %p717_p2, %p716_p1 }
  0x35   : > { %s641_s14 = sand.u32 (!%p122_p5), 1, %s476_s7  }
  0x36   : > { %125 = sbr.rel (%p122_p5) target bundleno = 135 (0x87), region = 24  ;;  %s283_s23 = sshll.u32 (!%p122_p5), %s641_s14, 2 }
  0x37   : > { %s128_s20 = scalar_lea.sflag (!%p122_p5), [#allocation3], %s641_s14  ;;  %s131_s24 = scalar_lea.vmem (!%p122_p5), [#allocation2], %s283_s23 }
  0x3d   : > { %463 = dma.done.wait (%p575_p8), %s128_s20, 64  }
  0x3e   : > { %465 = vsyncadd (%p575_p8), %s128_s20, 4294967232  ;;  %vm151_vm0 = vcmask 1043456   ;;  %v150_v0 = vld [vmem:[%s131_s24] sm:$0xf]  ;;  %s286_s21 = sshll.u32 %s488_s10, 1  ;;  %s149_s15 = scalar_lea.vmem [#allocation5], %s283_s23 }
  0x3f   : > { %v152_v1 = vsel %vm151_vm0, %v150_v0, -inf  ;;  %s186_s3 = sadd.s32 %s484_s9, %s286_s21  ;;  %s190_s18 = sshll.u32 %s149_s15, 4  ;;  %s651_s18 = int_to_ptr.vmem [resolvable:$true] %s190_s18 }
  0x40   : > { %v153_v2 = vrot.slane %v152_v1, 4  ;;  %s287_s19 = sshll.u32 %s186_s3, 6  ;;  %s175_s10 = scalar_lea.sflag [#allocation4], %s641_s14 }
  0x41   : > { %s656_s30 = scalar_lea.hbm %s709_s1, %s287_s19  ;;  %s402_s9 = scalar_lea.vmem %s651_s18, 64 }
  0x42   : > { %v154_v3 = vmax.f32 %v152_v1, %v153_v2  ;;  %p403_p8 = scmp.ne.s32.totalorder %s651_s18, %s402_s9  ;;  %p718_p9 = scmp.ne.s32.totalorder %s713_s22, 0 }
  0x43   : > { %s503_s26 = smov [#allocation5]  }
  0x44   : > { %v155_v4 = vrot.slane %v154_v3, 2  ;;  %p404_p12 = pnand %p403_p8, %p718_p9  ;;  %s406_s2 = sshll.u32 %s503_s26, 4  ;;  %s407_s2 = int_to_ptr.vmem [resolvable:$false] %s406_s2 }
  0x45   : > { %s408_s4 = scalar_lea.vmem %s407_s2, 128  ;;  %p409_p7 = scmp.lt.s32.totalorder %s651_s18, %s407_s2 }
  0x46   : > { %v156_v5 = vmax.f32 %v154_v3, %v155_v4  ;;  %p405_p0 = pneg %p404_p12  ;;  %p410_p13 = scmp.lt.s32.totalorder %s408_s4, %s402_s9 }
  0x48   : > { %v157_v6 = vrot.slane %v156_v5, 1  ;;  %p411_p4 = por %p410_p13, %p409_p7 }
  0x4a   : > { %v158_v7 = vmax.f32 %v156_v5, %v157_v6  ;;  %p412_p6 = pnand %p411_p4, %p405_p0 }
  0x4c   : > { %v159_v8 = vsub.f32 %v150_v0, %v158_v7 }
  0x4e   : > { %v160_v9 = vmul.f32 1.442695, %v159_v8 }
  0x50   : > { %368 = vpow2.f32 %v160_v9 }
  0x5a   : > { %v369_v10 = vpop.eup %368 }
  0x5b   : > { %v162_v11 = vsel %vm151_vm0, %v369_v10, 0.0 }
  0x5c   : > { %v163_v12 = vrot.slane %v162_v11, 4 }
  0x5e   : > { %v164_v13 = vadd.f32 %v163_v12, %v162_v11 }
  0x60   : > { %v165_v14 = vrot.slane %v164_v13, 2 }
  0x62   : > { %v166_v15 = vadd.f32 %v165_v14, %v164_v13 }
  0x64   : > { %v167_v16 = vrot.slane %v166_v15, 1 }
  0x66   : > { %v168_v17 = vadd.f32 %v167_v16, %v166_v15 }
  0x68   : > { %370 = vlog2.f32 %v168_v17 }
  0x72   : > { %v371_v18 = vpop.eup %370 }
  0x73   : > { %v170_v19 = vmul.f32 0.6931472, %v371_v18 }
  0x75   : > { %v171_v20 = vadd.f32 %v170_v19, %v158_v7 }
  0x77   : > { %v172_v21 = vsub.f32 %v150_v0, %v171_v20 }
  0x79   : > { %173 = vst [vmem:[%s149_s15] sm:$0xf] %v172_v21 }
  0x7a   : > { %415 = shalt.err (!%p412_p6)
}
  0x7b   : > { %s416_s5 = scalar_lea.hbm %s656_s30, 64  ;;  %s420_s20 = scalar_lea.hbm %s709_s1, 256 }
  0x7c   : > { %p417_p3 = scmp.ne.s32.totalorder %s656_s30, %s416_s5  ;;  %p421_p1 = scmp.lt.u32.totalorder %s656_s30, %s709_s1 }
  0x7d   : > { %p422_p2 = scmp.lt.u32.totalorder %s420_s20, %s416_s5  ;;  %p424_p8 = scmp.lt.u32.totalorder %s416_s5, %s656_s30 }
  0x7e   : > { %p418_p10 = pnand %p417_p3, %p718_p9 }
  0x7f   : > { %p423_p5 = por %p422_p2, %p421_p1 }
  0x80   : > { %p419_p11 = pneg %p418_p10 }
  0x81   : > { %p425_p12 = por %p424_p8, %p423_p5 }
  0x83   : > { %p426_p0 = pnand %p425_p12, %p419_p11 }
  0x85   : > { %429 = shalt.err (!%p426_p0)
}
  0x86   : > { %292 = dma.vmem_to_hbm [thread:$0]  (%p718_p9), %s651_s18, 64, %s656_s30, %s175_s10  }
  0x87 PF: > { %p303_p7 = scmp.ge.s32.totalorder %s500_s13, 2  ;;  %s202_s3 = sand.u32 1, %s472_s6  }
  0x88   : > { %p719_p13 = scmp.ne.s32.totalorder %s714_s25, 0  ;;  %s203_s15 = scalar_lea.sflag [#allocation4], %s202_s3 }
  0x8a   : > { %p299_p4 = pnand %p303_p7, %p719_p13 }
  0x8c   : > { %467 = dma.done.wait (!%p299_p4), %s203_s15, 64  }
  0x8d   : > { %469 = vsyncadd (!%p299_p4), %s203_s15, 4294967232  ;;  %s17_s13 = sadd.s32 1, %s500_s13   ;;  %s720_s6 = smov %s476_s7 }
  0x8e   : > { %p14_p6 = scmp.ge.s32.totalorder %s17_s13, 6   ;;  %s721_s7 = smov %s480_s8 }
  0x8f   : > { %s722_s8 = smov %s592_s27  ;;  %s723_s9 = smov %s492_s11 }
  0x90   : > { %s724_s10 = smov %s496_s12  ;;  %s725_s11 = smov %s728_s16 }
  0x91   : > { %s726_s12 = smov %s732_s17  ;;  %16 = sbr.rel (!%p14_p6) target bundleno = 7 (0x7), region = 69 }
  0x98   :  { %208 = vsyncpa [#allocation3], 1 }
  0x99   :  { %210 = vsyncpa [#allocation3 + $0x1], 1 }
  0x9a   :  { %211 = vsyncpa [#allocation4], 1 }
  0x9b   :  { %213 = vsyncpa [#allocation4 + $0x1], 1 }

</bundles_post_ra>
